<compile_context>
chip_gen: v6e
topology: v6e:2x2x1
jax: 0.10.0
libtpu: 0.0.40
codegen_flags: <defaults>
</compile_context>

<pallas_src>
import math

import jax
import jax.numpy as jnp
from jax.experimental import pallas as pl
from jax.experimental.pallas import tpu as pltpu


def _round_up(n, m):
    return ((n + m - 1) // m) * m


def _cdiv(a, b):
    return (a + b - 1) // b


def _make_value_nn_kernel(num_layers, matmul_dtype, tanh_dtype):
    """Fused MLP kernel. refs = (x, a, w0x, w0a, b0, w1, b1, ..., out)."""

    def kernel(*refs):
        x_ref, a_ref = refs[0], refs[1]
        out_ref = refs[-1]
        p = refs[2:-1]

        # Layer 0: concat fused as a split matmul; f32 accumulation on the MXU.
        w0x, w0a, b0 = p[0], p[1], p[2]
        h = (
            jnp.dot(x_ref[...], w0x[...], preferred_element_type=jnp.float32)
            + jnp.dot(a_ref[...], w0a[...], preferred_element_type=jnp.float32)
            + b0[...]
        )

        idx = 3
        for _ in range(1, num_layers):
            w_ref, b_ref = p[idx], p[idx + 1]
            idx += 2
            # tanh in tanh_dtype (bf16 on v6e/v7x EUP, f32 on v5e), then feed
            # the MXU in matmul_dtype; accumulation and bias add stay f32.
            h = jnp.tanh(h.astype(tanh_dtype))
            h = (
                jnp.dot(
                    h.astype(matmul_dtype),
                    w_ref[...],
                    preferred_element_type=jnp.float32,
                )
                + b_ref[...]
            )

        out_ref[...] = h.astype(out_ref.dtype)

    return kernel


def _default_tanh_dtype(matmul_dtype):
    """bf16 tanh only where the EUP/VPU is bf16-capable (v6e/v7x); else f32."""
    if jnp.dtype(matmul_dtype) == jnp.dtype(jnp.float32):
        return jnp.float32
    try:
        kind = jax.devices()[0].device_kind.lower()
    except Exception:
        return jnp.float32
    if "v6" in kind or "v7" in kind or "7x" in kind:
        return jnp.bfloat16
    return jnp.float32


def value_nn_forward(
    x, a, params, *, max_tile_b=8192, matmul_dtype=jnp.bfloat16, tanh_dtype=None
):
    """Pallas ValueNN forward.

    x:      (B, x_dim)  float32
    a:      (B, a_dim)  float32
    params: list of (W, b) with W shaped (in_features, out_features),
            b shaped (1, out_features)  -- already transposed vs. torch Linear.
    matmul_dtype: dtype of MXU operands (bf16 default on every generation;
            accumulation / bias adds / output are always f32).
    tanh_dtype: dtype for the tanh activations (None = auto: bf16 on v6e/v7x,
            f32 otherwise).
    """
    batch, x_dim = x.shape
    a_dim = a.shape[1]
    num_layers = len(params)
    out_dim = params[-1][0].shape[1]

    if tanh_dtype is None:
        tanh_dtype = _default_tanh_dtype(matmul_dtype)

    mm_itemsize = jnp.dtype(matmul_dtype).itemsize
    # 16-row alignment for bf16 (two rows per sublane), 8 for f32.
    align = 16 if mm_itemsize < 4 else 8

    # --- fuse the concat into layer 0 by splitting W0 along its input rows.
    w0, b0 = params[0]
    w0x, w0a = w0[:x_dim], w0[x_dim:]
    mm_weights = [w0x, w0a] + [w for (w, _) in params[1:]]
    biases = [b0] + [b for (_, b) in params[1:]]

    # --- VMEM-aware cap on the batch tile (keeps the big-tile win portable to
    #     v7x's 64 MiB physical VMEM and above v5e's 16 MiB scoped default).
    max_width = max(int(w.shape[1]) for (w, _) in params)
    bytes_per_row = (
        2 * (x_dim + a_dim) * mm_itemsize  # double-buffered x & a blocks
        + 2 * out_dim * 4                  # double-buffered output block
        + 4 * max_width * 4                # live f32 activation temporaries
    )
    vmem_budget = 40 << 20
    cap_rows = max(align, (vmem_budget // max(bytes_per_row, 1)) // align * align)
    max_tile = max(align, min(int(max_tile_b), cap_rows))

    # --- batch tiling: derive tile_b from cdiv(batch, num_tiles) (tail-friendly,
    #     padding bounded by ~align rows per tile) and force >= 2 grid steps for
    #     large batches so v7x's two TensorCores both get work.
    batch_al = _round_up(batch, align)
    num_tiles = max(1, _cdiv(batch_al, max_tile))
    if num_tiles == 1 and batch_al >= 256:
        num_tiles = 2
    tile_b = _round_up(_cdiv(batch_al, num_tiles), align)
    batch_p = num_tiles * tile_b

    pad_b = batch_p - batch
    x_p = jnp.pad(x, ((0, pad_b), (0, 0))) if pad_b else x
    a_p = jnp.pad(a, ((0, pad_b), (0, 0))) if pad_b else a

    if jnp.dtype(matmul_dtype) != jnp.dtype(jnp.float32):
        # Cast MXU operands outside the kernel: halves the kernel's input DMA
        # bytes (weight casts amortize across calls in real training loops).
        x_p = x_p.astype(matmul_dtype)
        a_p = a_p.astype(matmul_dtype)
        mm_weights = [w.astype(matmul_dtype) for w in mm_weights]

    flat_args = [x_p, a_p, mm_weights[0], mm_weights[1], biases[0]]
    for w, b in zip(mm_weights[2:], biases[1:]):
        flat_args.extend((w, b))

    grid = (num_tiles,)
    in_specs = [
        pl.BlockSpec((tile_b, x_dim), lambda i: (i, 0)),
        pl.BlockSpec((tile_b, a_dim), lambda i: (i, 0)),
    ] + [
        # Weights/biases: constant block index -> fetched once, VMEM-resident
        # across the whole grid (no re-DMA per step).
        pl.BlockSpec(arr.shape, lambda i: (0, 0))
        for arr in flat_args[2:]
    ]
    # Unpadded output: last block dim equals the full array dim, so the HBM
    # writeback is exactly batch_p * out_dim * 4 bytes (no 128-lane inflation).
    out_specs = pl.BlockSpec((tile_b, out_dim), lambda i: (i, 0))

    # Explicit VMEM limit with headroom (v5e scoped default is only 16 MiB;
    # stay well under v7x's 64 MiB physical VMEM).
    weight_bytes = sum(int(w.size) * mm_itemsize for w in mm_weights) + sum(
        int(b.size) * 4 for b in biases
    )
    vmem_est = tile_b * bytes_per_row + 2 * weight_bytes
    vmem_limit = int(min(48 << 20, max(2 * vmem_est, 24 << 20)))

    # Advisory cost estimate (helps XLA schedule this small custom call).
    flops = 2 * batch_p * sum(int(w.shape[0]) * int(w.shape[1]) for w in mm_weights)
    transcendentals = batch_p * sum(int(w.shape[1]) for (w, _) in params[:-1])
    bytes_accessed = (
        sum(int(arr.size) * arr.dtype.itemsize for arr in flat_args)
        + batch_p * out_dim * 4
    )

    out = pl.pallas_call(
        _make_value_nn_kernel(num_layers, matmul_dtype, tanh_dtype),
        out_shape=jax.ShapeDtypeStruct((batch_p, out_dim), jnp.float32),
        grid=grid,
        in_specs=in_specs,
        out_specs=out_specs,
        compiler_params=pltpu.CompilerParams(
            dimension_semantics=("parallel",),
            vmem_limit_bytes=vmem_limit,
        ),
        cost_estimate=pl.CostEstimate(
            flops=int(flops),
            transcendentals=int(transcendentals),
            bytes_accessed=int(bytes_accessed),
        ),
    )(*flat_args)

    # Strip the (small) batch padding.
    return out[:batch]


def init_value_nn_params(key, input_dim, output_dim, layers):
    """Deterministic init matching torch.nn.Linear default (U(-1/sqrt(fan_in), +))."""
    dims = [input_dim] + list(layers) + [output_dim]
    params = []
    for i in range(len(dims) - 1):
        fan_in, fan_out = dims[i], dims[i + 1]
        key, kw, kb = jax.random.split(key, 3)
        bound = 1.0 / math.sqrt(fan_in)
        w = jax.random.uniform(
            kw, (fan_in, fan_out), jnp.float32, minval=-bound, maxval=bound
        )
        b = jax.random.uniform(
            kb, (1, fan_out), jnp.float32, minval=-bound, maxval=bound
        )
        params.append((w, b))
    return params


def value_nn_reference(x, a, params):
    """Pure-JAX reference of the PyTorch forward, for correctness checks."""
    h = jnp.concatenate([x, a], axis=1)
    h = h @ params[0][0] + params[0][1]
    for w, b in params[1:]:
        h = jnp.tanh(h)
        h = h @ w + b
    return h


if __name__ == "__main__":
    # Small shapes consistent with the module: input_dim = x_dim + a_dim.
    batch = 64
    x_dim = 24
    a_dim = 8
    hidden_layers = [32, 32]
    output_dim = 1  # MADDPG critic emits a scalar Q-value per sample

    key = jax.random.PRNGKey(0)
    key, kx, ka = jax.random.split(key, 3)
    x = jax.random.normal(kx, (batch, x_dim), jnp.float32)
    a = jax.random.normal(ka, (batch, a_dim), jnp.float32)
    params = init_value_nn_params(key, x_dim + a_dim, output_dim, hidden_layers)

    ref = value_nn_reference(x, a, params)

    # 1) Exact f32 path (tight tolerance against the pure-JAX reference).
    out_f32 = jax.block_until_ready(
        value_nn_forward(x, a, params, matmul_dtype=jnp.float32)
    )
    assert out_f32.shape == (batch, output_dim)
    assert jnp.allclose(out_f32, ref, atol=1e-5, rtol=1e-5)

    # 2) Default path: bf16 MXU operands (all generations), f32 accumulation,
    #    auto bf16 tanh on v6e/v7x.
    out_bf16 = jax.block_until_ready(value_nn_forward(x, a, params))
    assert out_bf16.shape == (batch, output_dim)
    assert bool(jnp.all(jnp.isfinite(out_bf16)))
    assert jnp.allclose(out_bf16, ref, atol=1e-1, rtol=1e-1)

    # 3) Ragged batch + multi-tile grid (exercises batch padding, >=2 grid
    #    steps on the "parallel" axis, and the VMEM-resident weight path).
    out_rag = jax.block_until_ready(
        value_nn_forward(
            x[:19], a[:19], params, max_tile_b=16, matmul_dtype=jnp.float32
        )
    )
    assert out_rag.shape == (19, output_dim)
    assert jnp.allclose(out_rag, ref[:19], atol=1e-5, rtol=1e-5)

    print("KERNEL_OK")
</pallas_src>

<mosaic_0001>
module attributes {stable_mosaic.version = 11 : i64} {
  func.func @kernel(%arg0: i32, %arg1: memref<64x24xf32, #tpu.memory_space<vmem>>, %arg2: memref<64x8xf32, #tpu.memory_space<vmem>>, %arg3: memref<24x32xf32, #tpu.memory_space<vmem>>, %arg4: memref<8x32xf32, #tpu.memory_space<vmem>>, %arg5: memref<1x32xf32, #tpu.memory_space<vmem>>, %arg6: memref<32x32xf32, #tpu.memory_space<vmem>>, %arg7: memref<1x32xf32, #tpu.memory_space<vmem>>, %arg8: memref<32x1xf32, #tpu.memory_space<vmem>>, %arg9: memref<1x1xf32, #tpu.memory_space<vmem>>, %arg10: memref<64x1xf32, #tpu.memory_space<vmem>>) attributes {dimension_semantics = [#tpu.dimension_semantics<parallel>], iteration_bounds = array<i64: 1>, scalar_prefetch = 0 : i64, scratch_operands = 0 : i64, tpu.core_type = #tpu.core_type<tc>, window_params = [{transform_indices = @transform_0, window_bounds = array<i64: 64, 24>}, {transform_indices = @transform_1, window_bounds = array<i64: 64, 8>}, {pipeline_mode = #tpu.pipeline_mode<synchronous>, transform_indices = @transform_2, window_bounds = array<i64: 24, 32>}, {pipeline_mode = #tpu.pipeline_mode<synchronous>, transform_indices = @transform_3, window_bounds = array<i64: 8, 32>}, {pipeline_mode = #tpu.pipeline_mode<synchronous>, transform_indices = @transform_4, window_bounds = array<i64: 1, 32>}, {pipeline_mode = #tpu.pipeline_mode<synchronous>, transform_indices = @transform_5, window_bounds = array<i64: 32, 32>}, {pipeline_mode = #tpu.pipeline_mode<synchronous>, transform_indices = @transform_6, window_bounds = array<i64: 1, 32>}, {pipeline_mode = #tpu.pipeline_mode<synchronous>, transform_indices = @transform_7, window_bounds = array<i64: 32, 1>}, {pipeline_mode = #tpu.pipeline_mode<synchronous>, transform_indices = @transform_8, window_bounds = array<i64: 1, 1>}, {transform_indices = @transform_9, window_bounds = array<i64: 64, 1>}]} {
    %c0 = arith.constant 0 : index
    %c0_0 = arith.constant 0 : index
    %0 = vector.load %arg1[%c0, %c0_0] : memref<64x24xf32, #tpu.memory_space<vmem>>, vector<64x24xf32>
    %c0_1 = arith.constant 0 : index
    %c0_2 = arith.constant 0 : index
    %1 = vector.load %arg3[%c0_1, %c0_2] : memref<24x32xf32, #tpu.memory_space<vmem>>, vector<24x32xf32>
    %cst = arith.constant dense<0.000000e+00> : vector<64x32xf32>
    %2 = tpu.matmul %0, %1, %cst {dimension_numbers = #tpu.dot_dimension_numbers<[1], [0], [0], [1], [0, 0, 1, 1], [], []>} : vector<64x24xf32>, vector<24x32xf32>, vector<64x32xf32> -> vector<64x32xf32>
    %c0_3 = arith.constant 0 : index
    %c0_4 = arith.constant 0 : index
    %3 = vector.load %arg2[%c0_3, %c0_4] : memref<64x8xf32, #tpu.memory_space<vmem>>, vector<64x8xf32>
    %c0_5 = arith.constant 0 : index
    %c0_6 = arith.constant 0 : index
    %4 = vector.load %arg4[%c0_5, %c0_6] : memref<8x32xf32, #tpu.memory_space<vmem>>, vector<8x32xf32>
    %cst_7 = arith.constant dense<0.000000e+00> : vector<64x32xf32>
    %5 = tpu.matmul %3, %4, %cst_7 {dimension_numbers = #tpu.dot_dimension_numbers<[1], [0], [0], [1], [0, 0, 1, 1], [], []>} : vector<64x8xf32>, vector<8x32xf32>, vector<64x32xf32> -> vector<64x32xf32>
    %6 = arith.addf %2, %5 : vector<64x32xf32>
    %c0_8 = arith.constant 0 : index
    %c0_9 = arith.constant 0 : index
    %7 = vector.load %arg5[%c0_8, %c0_9] : memref<1x32xf32, #tpu.memory_space<vmem>>, vector<1x32xf32>
    %8 = vector.broadcast %7 : vector<1x32xf32> to vector<64x32xf32>
    %9 = arith.addf %6, %8 : vector<64x32xf32>
    %10 = math.tanh %9 : vector<64x32xf32>
    %c0_10 = arith.constant 0 : index
    %c0_11 = arith.constant 0 : index
    %11 = vector.load %arg6[%c0_10, %c0_11] : memref<32x32xf32, #tpu.memory_space<vmem>>, vector<32x32xf32>
    %cst_12 = arith.constant dense<0.000000e+00> : vector<64x32xf32>
    %12 = tpu.matmul %10, %11, %cst_12 {dimension_numbers = #tpu.dot_dimension_numbers<[1], [0], [0], [1], [0, 0, 1, 1], [], []>} : vector<64x32xf32>, vector<32x32xf32>, vector<64x32xf32> -> vector<64x32xf32>
    %c0_13 = arith.constant 0 : index
    %c0_14 = arith.constant 0 : index
    %13 = vector.load %arg7[%c0_13, %c0_14] : memref<1x32xf32, #tpu.memory_space<vmem>>, vector<1x32xf32>
    %14 = vector.broadcast %13 : vector<1x32xf32> to vector<64x32xf32>
    %15 = arith.addf %12, %14 : vector<64x32xf32>
    %16 = math.tanh %15 : vector<64x32xf32>
    %c0_15 = arith.constant 0 : index
    %c0_16 = arith.constant 0 : index
    %17 = vector.load %arg8[%c0_15, %c0_16] : memref<32x1xf32, #tpu.memory_space<vmem>>, vector<32x1xf32>
    %cst_17 = arith.constant dense<0.000000e+00> : vector<64x1xf32>
    %18 = tpu.matmul %16, %17, %cst_17 {dimension_numbers = #tpu.dot_dimension_numbers<[1], [0], [0], [1], [0, 0, 1, 1], [], []>} : vector<64x32xf32>, vector<32x1xf32>, vector<64x1xf32> -> vector<64x1xf32>
    %c0_18 = arith.constant 0 : index
    %c0_19 = arith.constant 0 : index
    %19 = vector.load %arg9[%c0_18, %c0_19] : memref<1x1xf32, #tpu.memory_space<vmem>>, vector<1x1xf32>
    %20 = vector.broadcast %19 : vector<1x1xf32> to vector<64x1xf32>
    %21 = arith.addf %18, %20 : vector<64x1xf32>
    %c0_20 = arith.constant 0 : index
    %c0_21 = arith.constant 0 : index
    %22 = vector.load %arg10[%c0_20, %c0_21] : memref<64x1xf32, #tpu.memory_space<vmem>>, vector<64x1xf32>
    tpu.vector_store %arg10[%c0_20, %c0_21], %21 {strides = array<i32>} : memref<64x1xf32, #tpu.memory_space<vmem>>, vector<64x1xf32>,
    return
  }
  func.func @transform_0(%arg0: i32) -> (i32, i32) {
    %c0_i32 = arith.constant 0 : i32
    %c0_i32_0 = arith.constant 0 : i32
    return %arg0, %c0_i32 : i32, i32
  }
  func.func @transform_1(%arg0: i32) -> (i32, i32) {
    %c0_i32 = arith.constant 0 : i32
    %c0_i32_0 = arith.constant 0 : i32
    return %arg0, %c0_i32 : i32, i32
  }
  func.func @transform_2(%arg0: i32) -> (i32, i32) {
    %c0_i32 = arith.constant 0 : i32
    %c0_i32_0 = arith.constant 0 : i32
    %c0_i32_1 = arith.constant 0 : i32
    return %c0_i32, %c0_i32_0 : i32, i32
  }
  func.func @transform_3(%arg0: i32) -> (i32, i32) {
    %c0_i32 = arith.constant 0 : i32
    %c0_i32_0 = arith.constant 0 : i32
    %c0_i32_1 = arith.constant 0 : i32
    return %c0_i32, %c0_i32_0 : i32, i32
  }
  func.func @transform_4(%arg0: i32) -> (i32, i32) {
    %c0_i32 = arith.constant 0 : i32
    %c0_i32_0 = arith.constant 0 : i32
    %c0_i32_1 = arith.constant 0 : i32
    return %c0_i32, %c0_i32_0 : i32, i32
  }
  func.func @transform_5(%arg0: i32) -> (i32, i32) {
    %c0_i32 = arith.constant 0 : i32
    %c0_i32_0 = arith.constant 0 : i32
    %c0_i32_1 = arith.constant 0 : i32
    return %c0_i32, %c0_i32_0 : i32, i32
  }
  func.func @transform_6(%arg0: i32) -> (i32, i32) {
    %c0_i32 = arith.constant 0 : i32
    %c0_i32_0 = arith.constant 0 : i32
    %c0_i32_1 = arith.constant 0 : i32
    return %c0_i32, %c0_i32_0 : i32, i32
  }
  func.func @transform_7(%arg0: i32) -> (i32, i32) {
    %c0_i32 = arith.constant 0 : i32
    %c0_i32_0 = arith.constant 0 : i32
    %c0_i32_1 = arith.constant 0 : i32
    return %c0_i32, %c0_i32_0 : i32, i32
  }
  func.func @transform_8(%arg0: i32) -> (i32, i32) {
    %c0_i32 = arith.constant 0 : i32
    %c0_i32_0 = arith.constant 0 : i32
    %c0_i32_1 = arith.constant 0 : i32
    return %c0_i32, %c0_i32_0 : i32, i32
  }
  func.func @transform_9(%arg0: i32) -> (i32, i32) {
    %c0_i32 = arith.constant 0 : i32
    %c0_i32_0 = arith.constant 0 : i32
    return %arg0, %c0_i32 : i32, i32
  }
}

</mosaic_0001>

<bundles_post_ra>
// kernel: tpu_custom_call.1
= control target key start
LH: loop header
LB: loop body
LE: loop exit
PB: predicated region body
PF: predicated region fallthrough
CT: control target
= control target key end

     0   :  { %vm54_vm0 = vcmask 64512   ;;  %vm184_vm1 = vcmask 195584   ;;  %vm348_vm2 = vcmask 261120   ;;  %vm626_vm3 = vcmask 7168   ;;  %s1029_s2 = inlined_call_operand.vmem [shape: f32[24,32], index: 2, kind: input, shape index: {}]   ;;  %s1030_s3 = inlined_call_operand.vmem [shape: f32[8,32], index: 3, kind: input, shape index: {}]   ;;  %s1031_s1 = inlined_call_operand.vmem [shape: f32[64,8], index: 1, kind: input, shape index: {}]   ;;  %s1032_s0 = inlined_call_operand.vmem [shape: f32[64,24], index: 0, kind: input, shape index: {}]   ;;  %s1033_s5 = inlined_call_operand.vmem [shape: f32[32,32], index: 5, kind: input, shape index: {}]   ;;  %s1034_s4 = inlined_call_operand.vmem [shape: f32[1,32], index: 4, kind: input, shape index: {}]   ;;  %s1035_s7 = inlined_call_operand.vmem [shape: f32[32,1], index: 7, kind: input, shape index: {}]   ;;  %s1036_s8 = inlined_call_operand.<no memory space> [shape: f32[1,1], index: 8, kind: input, shape index: {}]   ;;  %s1037_s6 = inlined_call_operand.vmem [shape: f32[1,32], index: 6, kind: input, shape index: {}]   ;;  %s1038_s9 = inlined_call_operand.vmem [shape: f32[64,1], index: 9, kind: output, shape index: {}]  }
   0x1   :  { %v44_v0 = vld [vmem:[%s1029_s2 + $0x10] sm:$0xff]  ;;  %v53_v1 = vld [vmem:[%s1030_s3] sm:$0xff]  ;;  %v43_v2 = vld [vmem:[%s1029_s2 + $0x8] sm:$0xff] }
   0x2   :  { %732 = vmatprep.subr.mxu1 %v44_v0  ;;  %718 = vmatprep.subr.mxu0 %v53_v1  ;;  %v45_v3 = vld [vmem:[%s1031_s1] sm:$0xff]  ;;  %v46_v4 = vld [vmem:[%s1031_s1 + $0x8] sm:$0xff]  ;;  %v47_v7 = vld [vmem:[%s1031_s1 + $0x10] sm:$0xff] }
   0x3   :  { %733 = vmatpush3.msra.mxu1 %v44_v0  ;;  %719 = vmatpush3.msra.mxu0 %v53_v1  ;;  %v42_v5 = vld [vmem:[%s1029_s2] sm:$0xff]  ;;  %v35_v8 = vld [vmem:[%s1032_s0 + $0x8] sm:$0xff]  ;;  %v48_v9 = vld [vmem:[%s1031_s1 + $0x18] sm:$0xff] }
   0x4   :  { %v34_v6 = vld [vmem:[%s1032_s0] sm:$0xff]  ;;  %734 = vmatprep.subr.mxu1 %v43_v2  ;;  %720 = vmatprep.mubr.msk.f32.mxu0 %vm54_vm0, %v45_v3  ;;  %v36_v10 = vld [vmem:[%s1032_s0 + $0x10] sm:$0xff]  ;;  %v37_v12 = vld [vmem:[%s1032_s0 + $0x18] sm:$0xff] }
   0x5   :  { %735 = vmatpush3.msra.mxu1 %v43_v2  ;;  %721 = vmatmul.mubr.msk.f32.vlgmr.msra.gmra.mxu0 %vm54_vm0, %v46_v4  ;;  %v49_v11 = vld [vmem:[%s1031_s1 + $0x20] sm:$0xff]  ;;  %v50_v13 = vld [vmem:[%s1031_s1 + $0x28] sm:$0xff]  ;;  %v51_v15 = vld [vmem:[%s1031_s1 + $0x30] sm:$0xff] }
   0x6   :  { %736 = vmatprep.subr.mxu1 %v42_v5  ;;  %738 = vmatprep.mubr.msk.f32.mxu1 %vm184_vm1, %v34_v6  ;;  %v38_v14 = vld [vmem:[%s1032_s0 + $0x20] sm:$0xff]  ;;  %v39_v16 = vld [vmem:[%s1032_s0 + $0x28] sm:$0xff]  ;;  %v52_v17 = vld [vmem:[%s1031_s1 + $0x38] sm:$0xff] }
   0x7   :  { %737 = vmatpush3.msra.mxu1 %v42_v5  ;;  %723 = vmatprep.mubr.msk.f32.mxu0 %vm54_vm0, %v47_v7  ;;  %v40_v18 = vld [vmem:[%s1032_s0 + $0x30] sm:$0xff]  ;;  %v41_v19 = vld [vmem:[%s1032_s0 + $0x38] sm:$0xff]  ;;  %v338_v22 = vld [vmem:[%s1033_s5 + $0x8] sm:$0xff]  ;;  %v14_v5 = vstv %s1036_s8 }
   0x8   :  { %739 = vmatmul.mubr.msk.f32.vlgmr.msra.gmra.mxu1 %vm184_vm1, %v35_v8  ;;  %v340_v20 = vld [vmem:[%s1033_s5 + $0x18] sm:$0xff]  ;;  %v339_v21 = vld [vmem:[%s1033_s5 + $0x10] sm:$0xff]  ;;  %v337_v23 = vld [vmem:[%s1033_s5] sm:$0xff]  ;;  %15 = vst [vmem:[#allocation2] sm:$0x1] %v14_v5 }
   0x9   :  { %724 = vmatmul.mubr.msk.f32.gmra.mxu0 %vm54_vm0, %v48_v9  ;;  %741 = vmatprep.mubr.msk.f32.mxu1 %vm184_vm1, %v36_v10  ;;  %v655_v28 = vld [vmem:[%s1034_s4] ss:$0 sm:$0xff]  ;;  %v489_v1 = vld [vmem:[%s1035_s7 + $0x18] sm:$0xff]  ;;  %v488_v2 = vld [vmem:[%s1035_s7 + $0x10] sm:$0xff] }
   0xa   :  { %726 = vmatprep.mubr.msk.f32.mxu0 %vm54_vm0, %v49_v11  ;;  %750 = vmatprep.subr.mxu0 %v340_v20  ;;  %v487_v3 = vld [vmem:[%s1035_s7 + $0x8] sm:$0xff]  ;;  %v486_v4 = vld [vmem:[%s1035_s7] sm:$0xff] }
   0xb   :  { %751 = vmatpush3.msra.mxu0 %v340_v20  ;;  %770 = vmatprep.subr.mxu1 %v489_v1  ;;  %v656_v6 = vld [vmem:[%s1037_s6] ss:$0 sm:$0xff] }
   0xc   :  { %742 = vmatmul.mubr.msk.f32.gmra.mxu1 %vm184_vm1, %v37_v12  ;;  %752 = vmatprep.subr.mxu0 %v339_v21 }
   0xd   :  { %727 = vmatmul.mubr.msk.f32.gmra.mxu0 %vm54_vm0, %v50_v13  ;;  %744 = vmatprep.mubr.msk.f32.mxu1 %vm184_vm1, %v38_v14 }
   0xe   :  { %729 = vmatprep.mubr.msk.f32.mxu0 %vm54_vm0, %v51_v15  ;;  %753 = vmatpush3.msra.mxu0 %v339_v21 }
   0xf   :  { %754 = vmatprep.subr.mxu0 %v338_v22  ;;  %771 = vmatpush3.msra.mxu1 %v489_v1 }
  0x10   :  { %745 = vmatmul.mubr.msk.f32.gmra.mxu1 %vm184_vm1, %v39_v16  ;;  %755 = vmatpush3.msra.mxu0 %v338_v22 }
  0x11   :  { %730 = vmatmul.mubr.msk.f32.gmra.mxu0 %vm54_vm0, %v52_v17  ;;  %747 = vmatprep.mubr.msk.f32.mxu1 %vm184_vm1, %v40_v18 }
  0x12   :  { %756 = vmatprep.subr.mxu0 %v337_v23  ;;  %772 = vmatprep.subr.mxu1 %v488_v2 }
  0x13   :  { %757 = vmatpush3.msra.mxu0 %v337_v23  ;;  %773 = vmatpush3.msra.mxu1 %v488_v2 }
  0x14   :  { %748 = vmatmul.mubr.msk.f32.gmra.mxu1 %vm184_vm1, %v41_v19  ;;  %774 = vmatprep.subr.mxu1 %v487_v3 }
  0x15   :  { %775 = vmatpush3.msra.mxu1 %v487_v3 }
  0x16   :  { %776 = vmatprep.subr.mxu1 %v486_v4 }
  0x17   :  { %777 = vmatpush3.msra.mxu1 %v486_v4 }
  0xc5   :  { %v722_v24 = vpop.f32.mrf.mxu0 }
  0xc7   :  { %v145_v25 = vpop.f32.mrf.mxu0 }
  0xc8   :  { %v740_v26 = vpop.f32.mrf.mxu1 }
  0xc9   :  { %v281_v27 = vadd.f32 %v740_v26, %v722_v24  ;;  %v725_v29 = vpop.f32.mrf.mxu0 }
  0xca   :  { %v275_v30 = vpop.f32.mrf.mxu1 }
  0xcb   :  { %v276_v31 = vadd.f32 %v275_v30, %v145_v25  ;;  %v155_v32 = vpop.f32.mrf.mxu0  ;;  %v322_v33 = vadd.f32 %v655_v28, %v281_v27 }
  0xcc   :  { %v743_v34 = vpop.f32.mrf.mxu1 }
  0xcd   :  { %v321_v35 = vadd.f32 %v655_v28, %v276_v31  ;;  %v291_v36 = vadd.f32 %v743_v34, %v725_v29  ;;  %v728_v37 = vpop.f32.mrf.mxu0  ;;  %v665_v31 = vld [vmem:[#allocation2] ss:$0 sm:$0xff] }
  0xce   :  { %v285_v38 = vpop.f32.mrf.mxu1 }
  0xcf   :  { %790 = vtanh.f32 %v321_v35  ;;  %v286_v39 = vadd.f32 %v285_v38, %v155_v32  ;;  %v165_v40 = vpop.f32.mrf.mxu0  ;;  %v324_v41 = vadd.f32 %v655_v28, %v291_v36 }
  0xd0   :  { %792 = vtanh.f32 %v322_v33  ;;  %v746_v42 = vpop.f32.mrf.mxu1 }
  0xd1   :  { %v323_v43 = vadd.f32 %v655_v28, %v286_v39  ;;  %v301_v44 = vadd.f32 %v746_v42, %v728_v37  ;;  %v731_v45 = vpop.f32.mrf.mxu0 }
  0xd2   :  { %v295_v46 = vpop.f32.mrf.mxu1 }
  0xd3   :  { %794 = vtanh.f32 %v323_v43  ;;  %v296_v47 = vadd.f32 %v295_v46, %v165_v40  ;;  %v326_v48 = vadd.f32 %v655_v28, %v301_v44  ;;  %v175_v52 = vpop.f32.mrf.mxu0 }
  0xd4   :  { %796 = vtanh.f32 %v324_v41  ;;  %v749_v49 = vpop.f32.mrf.mxu1 }
  0xd5   :  { %v325_v50 = vadd.f32 %v655_v28, %v296_v47  ;;  %v311_v51 = vadd.f32 %v749_v49, %v731_v45 }
  0xd6   :  { %v305_v53 = vpop.f32.mrf.mxu1 }
  0xd7   :  { %798 = vtanh.f32 %v325_v50  ;;  %v306_v54 = vadd.f32 %v305_v53, %v175_v52  ;;  %v328_v55 = vadd.f32 %v655_v28, %v311_v51 }
  0xd8   :  { %800 = vtanh.f32 %v326_v48 }
  0xd9   :  { %v327_v56 = vadd.f32 %v655_v28, %v306_v54 }
  0xdb   :  { %802 = vtanh.f32 %v327_v56 }
  0xdc   :  { %v791_v57 = vpop.eup %790  ;;  %804 = vtanh.f32 %v328_v55 }
  0xdd   :  { %v793_v58 = vpop.eup %792  ;;  %758 = vmatprep.mubr.msk.f32.mxu0 %vm348_vm2, %v791_v57 }
  0xde   :  { %759 = vmatmul.mubr.msk.f32.vlgmr.msra.gmra.mxu0 %vm348_vm2, %v793_v58 }
  0xe0   :  { %v795_v59 = vpop.eup %794 }
  0xe1   :  { %v797_v60 = vpop.eup %796  ;;  %761 = vmatprep.mubr.msk.f32.mxu0 %vm348_vm2, %v795_v59 }
  0xe2   :  { %762 = vmatmul.mubr.msk.f32.gmra.mxu0 %vm348_vm2, %v797_v60 }
  0xe4   :  { %v799_v61 = vpop.eup %798 }
  0xe5   :  { %v801_v62 = vpop.eup %800  ;;  %764 = vmatprep.mubr.msk.f32.mxu0 %vm348_vm2, %v799_v61 }
  0xe6   :  { %765 = vmatmul.mubr.msk.f32.gmra.mxu0 %vm348_vm2, %v801_v62 }
  0xe8   :  { %v803_v63 = vpop.eup %802 }
  0xe9   :  { %v805_v0 = vpop.eup %804  ;;  %767 = vmatprep.mubr.msk.f32.mxu0 %vm348_vm2, %v803_v63 }
  0xea   :  { %768 = vmatmul.mubr.msk.f32.gmra.mxu0 %vm348_vm2, %v805_v0 }
 0x19e   :  { %v760_v7 = vpop.f32.mrf.mxu0 }
 0x19f   :  { %v445_v8 = vadd.f32 %v760_v7, %v656_v6 }
 0x1a0   :  { %v439_v9 = vpop.f32.mrf.mxu0 }
 0x1a1   :  { %v440_v10 = vadd.f32 %v656_v6, %v439_v9 }
 0x1a2   :  { %v763_v11 = vpop.f32.mrf.mxu0 }
 0x1a3   :  { %806 = vtanh.f32 %v440_v10  ;;  %v455_v12 = vadd.f32 %v763_v11, %v656_v6 }
 0x1a4   :  { %808 = vtanh.f32 %v445_v8  ;;  %v449_v13 = vpop.f32.mrf.mxu0 }
 0x1a5   :  { %v450_v14 = vadd.f32 %v656_v6, %v449_v13 }
 0x1a6   :  { %v766_v15 = vpop.f32.mrf.mxu0 }
 0x1a7   :  { %810 = vtanh.f32 %v450_v14  ;;  %v465_v16 = vadd.f32 %v766_v15, %v656_v6 }
 0x1a8   :  { %812 = vtanh.f32 %v455_v12  ;;  %v459_v17 = vpop.f32.mrf.mxu0 }
 0x1a9   :  { %v460_v18 = vadd.f32 %v656_v6, %v459_v17 }
 0x1aa   :  { %v769_v19 = vpop.f32.mrf.mxu0 }
 0x1ab   :  { %814 = vtanh.f32 %v460_v18  ;;  %v475_v20 = vadd.f32 %v769_v19, %v656_v6 }
 0x1ac   :  { %816 = vtanh.f32 %v465_v16  ;;  %v469_v21 = vpop.f32.mrf.mxu0 }
 0x1ad   :  { %v470_v22 = vadd.f32 %v656_v6, %v469_v21 }
 0x1af   :  { %818 = vtanh.f32 %v470_v22 }
 0x1b0   :  { %v807_v23 = vpop.eup %806  ;;  %820 = vtanh.f32 %v475_v20 }
 0x1b1   :  { %v809_v24 = vpop.eup %808  ;;  %778 = vmatprep.mubr.msk.f32.mxu1 %vm348_vm2, %v807_v23 }
 0x1b2   :  { %779 = vmatmul.mubr.msk.f32.vlgmr.msra.gmra.mxu1 %vm348_vm2, %v809_v24 }
 0x1b4   :  { %v811_v25 = vpop.eup %810 }
 0x1b5   :  { %v813_v26 = vpop.eup %812  ;;  %781 = vmatprep.mubr.msk.f32.mxu1 %vm348_vm2, %v811_v25 }
 0x1b6   :  { %782 = vmatmul.mubr.msk.f32.gmra.mxu1 %vm348_vm2, %v813_v26 }
 0x1b8   :  { %v815_v27 = vpop.eup %814 }
 0x1b9   :  { %v817_v28 = vpop.eup %816  ;;  %784 = vmatprep.mubr.msk.f32.mxu1 %vm348_vm2, %v815_v27 }
 0x1ba   :  { %785 = vmatmul.mubr.msk.f32.gmra.mxu1 %vm348_vm2, %v817_v28 }
 0x1bc   :  { %v819_v29 = vpop.eup %818 }
 0x1bd   :  { %v821_v30 = vpop.eup %820  ;;  %787 = vmatprep.mubr.msk.f32.mxu1 %vm348_vm2, %v819_v29 }
 0x1be   :  { %788 = vmatmul.mubr.msk.f32.gmra.mxu1 %vm348_vm2, %v821_v30 }
 0x272   :  { %v780_v32 = vpop.f32.mrf.mxu1 }
 0x273   :  { %v593_v33 = vadd.f32 %v780_v32, %v665_v31 }
 0x274   :  { %v587_v34 = vpop.f32.mrf.mxu1 }
 0x275   :  { %628 = vst.msk [vmem:[%s1038_s9 + $0x8] sm:$0xff] %vm626_vm3, %v593_v33  ;;  %v588_v35 = vadd.f32 %v665_v31, %v587_v34 }
 0x276   :  { %v783_v36 = vpop.f32.mrf.mxu1 }
 0x277   :  { %627 = vst.msk [vmem:[%s1038_s9] sm:$0xff] %vm626_vm3, %v588_v35  ;;  %v603_v37 = vadd.f32 %v783_v36, %v665_v31 }
 0x278   :  { %v597_v38 = vpop.f32.mrf.mxu1 }
 0x279   :  { %630 = vst.msk [vmem:[%s1038_s9 + $0x18] sm:$0xff] %vm626_vm3, %v603_v37  ;;  %v598_v39 = vadd.f32 %v665_v31, %v597_v38 }
 0x27a   :  { %v786_v40 = vpop.f32.mrf.mxu1 }
 0x27b   :  { %629 = vst.msk [vmem:[%s1038_s9 + $0x10] sm:$0xff] %vm626_vm3, %v598_v39  ;;  %v613_v41 = vadd.f32 %v786_v40, %v665_v31 }
 0x27c   :  { %v607_v42 = vpop.f32.mrf.mxu1 }
 0x27d   :  { %632 = vst.msk [vmem:[%s1038_s9 + $0x28] sm:$0xff] %vm626_vm3, %v613_v41  ;;  %v608_v43 = vadd.f32 %v665_v31, %v607_v42 }
 0x27e   :  { %v789_v44 = vpop.f32.mrf.mxu1 }
 0x27f   :  { %631 = vst.msk [vmem:[%s1038_s9 + $0x20] sm:$0xff] %vm626_vm3, %v608_v43  ;;  %v623_v45 = vadd.f32 %v789_v44, %v665_v31 }
 0x280   :  { %v617_v46 = vpop.f32.mrf.mxu1 }
 0x281   :  { %634 = vst.msk [vmem:[%s1038_s9 + $0x38] sm:$0xff] %vm626_vm3, %v623_v45  ;;  %v618_v47 = vadd.f32 %v665_v31, %v617_v46 }
 0x283   :  { %633 = vst.msk [vmem:[%s1038_s9 + $0x30] sm:$0xff] %vm626_vm3, %v618_v47 }

</bundles_post_ra>
